<compile_context>
chip_gen: v7x
topology: tpu7x:2x2x1
jax: 0.10.0
libtpu: 0.0.40
codegen_flags: <defaults>
</compile_context>

<pallas_src>
import jax
import jax.numpy as jnp
import numpy as np
from jax.experimental import pallas as pl
from jax.experimental.pallas import tpu as pltpu

_TARGET_BLOCK_BYTES = 4 * 1024 * 1024  # ~4 MiB per block per buffer


def _copy_kernel(x_ref, o_ref):
    # Pure lane-dense copy of one (rows_per_tile, lane_chunk) block.
    o_ref[...] = x_ref[...]


def _choose_tiles(rows: int, width: int, itemsize: int):
    """Pick (rows_per_tile, lane_chunk) giving ~_TARGET_BLOCK_BYTES blocks.

    Constraints honored:
      * lane_chunk == width (full extent) OR a multiple of 128 dividing width.
      * rows_per_tile == rows (full extent) OR a multiple of 8.
    """
    row_bytes = width * itemsize

    # Lane tiling only when a single row is already bigger than the target
    # and the row width is 128-aligned (otherwise keep the full row).
    if row_bytes > _TARGET_BLOCK_BYTES and width % 128 == 0:
        chunk = max(128, (_TARGET_BLOCK_BYTES // itemsize) // 128 * 128)
        chunk = min(chunk, width)
        while width % chunk != 0:  # shrink to a 128-aligned divisor of width
            chunk -= 128
        lane = chunk
    else:
        lane = width

    lane_bytes = lane * itemsize
    rows_per = max(1, _TARGET_BLOCK_BYTES // lane_bytes)
    if rows_per >= rows:
        rows_per = rows  # full extent: always legal
    else:
        rows_per = max(8, (rows_per // 8) * 8)  # sublane-aligned
        rows_per = min(rows_per, rows)
    return rows_per, lane


def merge_temporal_dim(x_seq: jax.Array) -> jax.Array:
    """Equivalent of MergeTemporalDim.forward: (T, B, C, H, W) -> (T*B, C, H, W)."""
    T, B, C, H, W = x_seq.shape
    rows = T * B
    width = C * H * W
    itemsize = np.dtype(x_seq.dtype).itemsize

    # Free, metadata-only reshape: present the copy as a lane-dense 2D slab.
    x2d = x_seq.reshape(rows, width)

    rows_per, lane = _choose_tiles(rows, width, itemsize)
    grid = (pl.cdiv(rows, rows_per), pl.cdiv(width, lane))

    out2d = pl.pallas_call(
        _copy_kernel,
        out_shape=jax.ShapeDtypeStruct((rows, width), x_seq.dtype),
        grid_spec=pl.GridSpec(
            grid=grid,
            in_specs=[pl.BlockSpec((rows_per, lane), lambda i, j: (i, j))],
            out_specs=pl.BlockSpec((rows_per, lane), lambda i, j: (i, j)),
        ),
        compiler_params=pltpu.CompilerParams(
            # Independent copy blocks: shard across v7x's 2 TensorCores.
            dimension_semantics=("parallel", "parallel"),
            # Above the 16 MiB v5e scoped default; well within physical VMEM
            # on all generations (blocks are capped at ~4 MiB per buffer).
            vmem_limit_bytes=32 * 1024 * 1024,
        ),
    )(x2d)

    # Free metadata reshape back to the PyTorch output layout.
    return out2d.reshape(rows, C, H, W)


if __name__ == "__main__":
    # Small shapes: T=4 timesteps, batch=2, channels=4, spatial=16x16.
    T, B, C, H, W = 4, 2, 4, 16, 16
    key = jax.random.PRNGKey(0)
    x_seq = jax.random.normal(key, (T, B, C, H, W), dtype=jnp.float32)

    out = merge_temporal_dim(x_seq)
    out = jax.block_until_ready(out)

    # Reference check against the plain flatten semantics.
    ref = x_seq.reshape(T * B, C, H, W)
    assert out.shape == (T * B, C, H, W), out.shape
    assert out.dtype == x_seq.dtype
    assert jnp.array_equal(out, ref), "mismatch vs reference flatten"

    print("KERNEL_OK")
</pallas_src>

<mosaic_0001>
module attributes {stable_mosaic.version = 11 : i64} {
  func.func @_copy_kernel(%arg0: i32, %arg1: i32, %arg2: memref<8x1024xf32, #tpu.memory_space<vmem>>, %arg3: memref<8x1024xf32, #tpu.memory_space<vmem>>) attributes {dimension_semantics = [#tpu.dimension_semantics<parallel>, #tpu.dimension_semantics<parallel>], iteration_bounds = array<i64: 1, 1>, scalar_prefetch = 0 : i64, scratch_operands = 0 : i64, tpu.core_type = #tpu.core_type<tc>, window_params = [{transform_indices = @transform_0, window_bounds = array<i64: 8, 1024>}, {transform_indices = @transform_1, window_bounds = array<i64: 8, 1024>}]} {
    %c0 = arith.constant 0 : index
    %c0_0 = arith.constant 0 : index
    %0 = vector.load %arg2[%c0, %c0_0] : memref<8x1024xf32, #tpu.memory_space<vmem>>, vector<8x1024xf32>
    %c0_1 = arith.constant 0 : index
    %c0_2 = arith.constant 0 : index
    %1 = vector.load %arg3[%c0_1, %c0_2] : memref<8x1024xf32, #tpu.memory_space<vmem>>, vector<8x1024xf32>
    tpu.vector_store %arg3[%c0_1, %c0_2], %0 {strides = array<i32>} : memref<8x1024xf32, #tpu.memory_space<vmem>>, vector<8x1024xf32>,
    return
  }
  func.func @transform_0(%arg0: i32, %arg1: i32) -> (i32, i32) {
    %c0_i32 = arith.constant 0 : i32
    return %arg0, %arg1 : i32, i32
  }
  func.func @transform_1(%arg0: i32, %arg1: i32) -> (i32, i32) {
    %c0_i32 = arith.constant 0 : i32
    return %arg0, %arg1 : i32, i32
  }
}

</mosaic_0001>

<bundles_post_ra>
// kernel: tpu_custom_call.1
= control target key start
LH: loop header
LB: loop body
LE: loop exit
PB: predicated region body
PF: predicated region fallthrough
CT: control target
= control target key end

     0   :  { %6 = vsyncpa [#allocation3], 0  ;;  %s138_s0 = inlined_call_operand.hbm [shape: f32[8,1024], index: 0, kind: input, shape index: {}]   ;;  %s139_s1 = inlined_call_operand.hbm [shape: f32[8,1024], index: 1, kind: output, shape index: {}]  }
   0x1   :  { %7 = vsyncpa [#allocation4], 0  ;;  %s102_s6 = smov [#allocation2]   ;;  %s54_s10 = scalar_lea.hbm %s138_s0, 1024 }
   0x2   :  { %s14_s7 = sshll.u32 %s102_s6, 4  ;;  %p55_p0 = scmp.ne.s32.totalorder %s138_s0, %s54_s10  ;;  %s15_s7 = int_to_ptr.vmem [resolvable:$true] %s14_s7 }
   0x3   :  { %p58_p1 = scmp.lt.u32.totalorder %s54_s10, %s138_s0 }
   0x5   :  { %p60_p2 = pnand %p58_p1, %p55_p0 }
   0x7   :  { %63 = shalt.err (!%p60_p2)
}
   0x8   :  { %s64_s15 = scalar_lea.vmem %s15_s7, 1024  ;;  %p69_p4 = scmp.lt.s32.totalorder %s15_s7, %s15_s7 }
   0x9   :  { %p65_p3 = scmp.ne.s32.totalorder %s15_s7, %s64_s15  ;;  %p70_p5 = scmp.lt.s32.totalorder %s64_s15, %s64_s15 }
   0xb   :  { %p71_p6 = por %p70_p5, %p69_p4 }
   0xd   :  { %p72_p7 = pnand %p71_p6, %p65_p3 }
   0xf   :  { %75 = shalt.err (!%p72_p7)
}
  0x10   :  { %17 = dma.hbm_to_vmem [thread:$0]  %s138_s0, 1024, %s15_s7, [#allocation3]  }
  0x11   :  { %98 = dma.done.wait [#allocation3], 1024  }
  0x12   :  { %99 = vsyncadd [#allocation3], 4294966272  ;;  %s103_s18 = smov [#allocation5]   ;;  %v21_v0 = vld [vmem:[#allocation2] sm:$0xff]  ;;  %v22_v1 = vld [vmem:[#allocation2 + $0x8] sm:$0xff] }
  0x13   :  { %s43_s19 = sshll.u32 %s103_s18, 4  ;;  %v23_v2 = vld [vmem:[#allocation2 + $0x10] sm:$0xff]  ;;  %29 = vst [vmem:[#allocation5] sm:$0xff] %v21_v0  ;;  %30 = vst [vmem:[#allocation5 + $0x8] sm:$0xff] %v22_v1  ;;  %v24_v3 = vld [vmem:[#allocation2 + $0x18] sm:$0xff]  ;;  %s44_s19 = int_to_ptr.vmem [resolvable:$true] %s43_s19 }
  0x14   :  { %31 = vst [vmem:[#allocation5 + $0x10] sm:$0xff] %v23_v2  ;;  %v25_v4 = vld [vmem:[#allocation2 + $0x20] sm:$0xff]  ;;  %v26_v5 = vld [vmem:[#allocation2 + $0x28] sm:$0xff]  ;;  %32 = vst [vmem:[#allocation5 + $0x18] sm:$0xff] %v24_v3  ;;  %s76_s0 = scalar_lea.vmem %s44_s19, 1024  ;;  %p81_p9 = scmp.lt.s32.totalorder %s44_s19, %s44_s19 }
  0x15   :  { %33 = vst [vmem:[#allocation5 + $0x20] sm:$0xff] %v25_v4  ;;  %34 = vst [vmem:[#allocation5 + $0x28] sm:$0xff] %v26_v5  ;;  %v27_v6 = vld [vmem:[#allocation2 + $0x30] sm:$0xff]  ;;  %v28_v7 = vld [vmem:[#allocation2 + $0x38] sm:$0xff]  ;;  %p77_p8 = scmp.ne.s32.totalorder %s44_s19, %s76_s0  ;;  %p82_p10 = scmp.lt.s32.totalorder %s76_s0, %s76_s0 }
  0x16   :  { %35 = vst [vmem:[#allocation5 + $0x30] sm:$0xff] %v27_v6  ;;  %36 = vst [vmem:[#allocation5 + $0x38] sm:$0xff] %v28_v7 }
  0x17   :  { %p83_p11 = por %p82_p10, %p81_p9 }
  0x19   :  { %p84_p12 = pnand %p83_p11, %p77_p8 }
  0x1b   :  { %87 = shalt.err (!%p84_p12)
}
  0x1c   :  { %s88_s22 = scalar_lea.hbm %s139_s1, 1024 }
  0x1d   :  { %p89_p13 = scmp.ne.s32.totalorder %s139_s1, %s88_s22  ;;  %p92_p0 = scmp.lt.u32.totalorder %s88_s22, %s139_s1 }
  0x1f   :  { %p94_p1 = pnand %p92_p0, %p89_p13 }
  0x21   :  { %97 = shalt.err (!%p94_p1)
}
  0x22   :  { %46 = dma.vmem_to_hbm [thread:$0]  %s44_s19, 1024, %s139_s1, [#allocation4]  }
  0x23   :  { %100 = dma.done.wait [#allocation4], 1024  }
  0x24   :  { %101 = vsyncadd [#allocation4], 4294966272 }
  0x25   :  { %50 = vsyncpa [#allocation3], 1 }
  0x26   :  { %51 = vsyncpa [#allocation4], 1 }

</bundles_post_ra>
